<compile_context>
chip_gen: v5e
topology: v5e:2x2
jax: 0.10.0
libtpu: 0.0.40
codegen_flags: <defaults>
</compile_context>

<pallas_src>
import jax
import jax.numpy as jnp
from jax import lax
from jax.experimental import pallas as pl
from jax.experimental.pallas import tpu as pltpu

EPS = 1e-9
LANES = 128
NUM_CORES = 2  # v7x has 2 TensorCores; harmless (one extra grid slice) on v5e/v6e.


def _make_dice_kernel(n_valid, tile_rows, steps, needs_mask):
    """Kernel producing per-core partial sums of (p*t, p, t) as (8,128) tiles."""

    def kernel(logits_ref, targets_ref, out_ref):
        c = pl.program_id(0)  # core slice (parallel)
        j = pl.program_id(1)  # block step within the slice (arbitrary/reduction)

        @pl.when(j == 0)
        def _():
            out_ref[...] = jnp.zeros_like(out_ref)

        x = logits_ref[...].astype(jnp.float32)
        t = targets_ref[...].astype(jnp.float32)
        p = 1.0 / (1.0 + jnp.exp(-x))  # sigmoid: EUP exp + VPU divide

        if needs_mask:
            # Mask everything past the true element count (covers lane-tail pad,
            # ragged last block, and the fully-out-of-range duplicate block read
            # by the clamped index_map on an odd block split).
            blk = c * steps + j  # logical (unclamped) block index
            row = lax.broadcasted_iota(jnp.int32, (tile_rows, LANES), 0)
            lane = lax.broadcasted_iota(jnp.int32, (tile_rows, LANES), 1)
            idx = (blk * tile_rows + row) * LANES + lane  # global element index
            valid = idx < n_valid
            p = jnp.where(valid, p, 0.0)
            t = jnp.where(valid, t, 0.0)

        def fold(v):
            # (tile_rows, 128) -> (8, 128): vreg-aligned adds only (pure VPU),
            # no per-step cross-lane/sublane XLU reduction.
            return jnp.sum(v.reshape(tile_rows // 8, 8, LANES), axis=0)

        out_ref[0, 0, :, :] += fold(p * t)  # sum(p * t)
        out_ref[0, 1, :, :] += fold(p)      # sum(p)
        out_ref[0, 2, :, :] += fold(t)      # sum(t)

    return kernel


def dice_loss(logits, targets, *, eps=EPS, tile_rows=2048):
    """Pallas implementation of DiceLoss.forward(logits, targets).

    The per-sample .view(num, -1) in the PyTorch module does not change the
    global sums, so the dice score reduces over all elements.
    """
    assert logits.shape == targets.shape
    assert tile_rows % 8 == 0 and tile_rows >= 8
    n = logits.size

    # Stream in native dtype (no astype copy); reshape of a contiguous array is
    # free.  Pad only when numel is not a multiple of 8*128 (one copy; rare for
    # real NCHW shapes).
    flat_l = logits.reshape(-1)
    flat_t = targets.reshape(-1)
    chunk = 8 * LANES
    pad = (-n) % chunk
    if pad:
        flat_l = jnp.pad(flat_l, (0, pad))
        flat_t = jnp.pad(flat_t, (0, pad))
    rows = (n + pad) // LANES  # multiple of 8

    tr = min(tile_rows, rows)                    # multiple of 8, <= rows
    blocks_total = pl.cdiv(rows, tr)
    steps = pl.cdiv(blocks_total, NUM_CORES)
    needs_mask = (pad > 0) or (rows % tr != 0) or (NUM_CORES * steps != blocks_total)

    l2 = flat_l.reshape(rows, LANES)
    t2 = flat_t.reshape(rows, LANES)

    def in_map(c, j):
        # Clamp so the (possible) one extra step on an odd block split re-reads a
        # valid block; that step is fully masked out in-kernel.
        return (jnp.minimum(c * steps + j, blocks_total - 1), 0)

    kernel = _make_dice_kernel(n, tr, steps, needs_mask)

    partials = pl.pallas_call(
        kernel,
        out_shape=jax.ShapeDtypeStruct((NUM_CORES, 3, 8, LANES), jnp.float32),
        grid=(NUM_CORES, steps),
        in_specs=[
            pl.BlockSpec((tr, LANES), in_map),
            pl.BlockSpec((tr, LANES), in_map),
        ],
        out_specs=pl.BlockSpec((1, 3, 8, LANES), lambda c, j: (c, 0, 0, 0)),
        compiler_params=pltpu.CompilerParams(
            dimension_semantics=("parallel", "arbitrary")),
    )(l2, t2)

    # Single tiny cross-lane reduction + dice arithmetic on (cores, 3, 8, 128).
    sums = jnp.sum(partials, axis=(0, 2, 3))  # [sum(p*t), sum(p), sum(t)]
    intersection = 2.0 * sums[0]
    union = sums[1] + sums[2]
    # TODO(synk): like the PyTorch module, no guard for union == 0 (degenerate
    # all-zero inputs would yield inf/NaN there too).
    return 1.0 - (intersection + eps) / union


def _dice_loss_ref(logits, targets, eps=EPS):
    num = logits.shape[0]
    p = jax.nn.sigmoid(logits).reshape(num, -1)
    t = targets.reshape(num, -1)
    intersection = 2.0 * jnp.sum(p * t)
    union = jnp.sum(p) + jnp.sum(t)
    return 1.0 - (intersection + eps) / union


if __name__ == "__main__":
    key = jax.random.PRNGKey(0)
    k1, k2, k3, k4 = jax.random.split(key, 4)

    # NCHW, same convention as the PyTorch module.
    logits = jax.random.normal(k1, (2, 4, 16, 16), dtype=jnp.float32)
    targets = (jax.random.uniform(k2, (2, 4, 16, 16)) > 0.5).astype(jnp.float32)

    loss = dice_loss(logits, targets)
    jax.block_until_ready(loss)
    ref = _dice_loss_ref(logits, targets)
    assert jnp.allclose(loss, ref, atol=1e-5, rtol=1e-5), (loss, ref)

    # Ragged size (not a multiple of 1024) to exercise the in-kernel tail mask.
    logits2 = jax.random.normal(k3, (3, 5, 7, 9), dtype=jnp.float32)
    targets2 = (jax.random.uniform(k4, (3, 5, 7, 9)) > 0.5).astype(jnp.float32)
    loss2 = dice_loss(logits2, targets2)
    jax.block_until_ready(loss2)
    ref2 = _dice_loss_ref(logits2, targets2)
    assert jnp.allclose(loss2, ref2, atol=1e-5, rtol=1e-5), (loss2, ref2)

    print("KERNEL_OK")
</pallas_src>

<mosaic_0001>
module attributes {stable_mosaic.version = 11 : i64} {
  func.func @kernel(%arg0: i32, %arg1: i32, %arg2: memref<16x128xf32, #tpu.memory_space<vmem>>, %arg3: memref<16x128xf32, #tpu.memory_space<vmem>>, %arg4: memref<1x3x8x128xf32, #tpu.memory_space<vmem>>) attributes {dimension_semantics = [#tpu.dimension_semantics<parallel>, #tpu.dimension_semantics<arbitrary>], iteration_bounds = array<i64: 2, 1>, scalar_prefetch = 0 : i64, scratch_operands = 0 : i64, tpu.core_type = #tpu.core_type<tc>, window_params = [{transform_indices = @transform_0, window_bounds = array<i64: 16, 128>}, {transform_indices = @transform_1, window_bounds = array<i64: 16, 128>}, {transform_indices = @transform_2, window_bounds = array<i64: 1, 3, 8, 128>}]} {
    %c0_i32 = arith.constant 0 : i32
    %0 = arith.cmpi eq, %arg1, %c0_i32 : i32
    %1 = arith.extui %0 : i1 to i32
    %c0_i32_0 = arith.constant 0 : i32
    %2 = arith.cmpi ne, %1, %c0_i32_0 : i32
    scf.if %2 {
      %cst_33 = arith.constant 0.000000e+00 : f32
      %53 = vector.broadcast %cst_33 : f32 to vector<1x3x8x128xf32>
      %c0_34 = arith.constant 0 : index
      %c0_35 = arith.constant 0 : index
      %c0_36 = arith.constant 0 : index
      %c0_37 = arith.constant 0 : index
      %54 = vector.load %arg4[%c0_34, %c0_35, %c0_36, %c0_37] : memref<1x3x8x128xf32, #tpu.memory_space<vmem>>, vector<1x3x8x128xf32>
      tpu.vector_store %arg4[%c0_34, %c0_35, %c0_36, %c0_37], %53 {strides = array<i32>} : memref<1x3x8x128xf32, #tpu.memory_space<vmem>>, vector<1x3x8x128xf32>,
    } else {
    }
    %c0 = arith.constant 0 : index
    %c0_1 = arith.constant 0 : index
    %3 = vector.load %arg2[%c0, %c0_1] : memref<16x128xf32, #tpu.memory_space<vmem>>, vector<16x128xf32>
    %c0_2 = arith.constant 0 : index
    %c0_3 = arith.constant 0 : index
    %4 = vector.load %arg3[%c0_2, %c0_3] : memref<16x128xf32, #tpu.memory_space<vmem>>, vector<16x128xf32>
    %cst = arith.constant 0.000000e+00 : f32
    %5 = vector.broadcast %cst : f32 to vector<16x128xf32>
    %6 = arith.subf %5, %3 : vector<16x128xf32>
    %7 = math.exp %6 : vector<16x128xf32>
    %cst_4 = arith.constant 1.000000e+00 : f32
    %8 = vector.broadcast %cst_4 : f32 to vector<16x128xf32>
    %9 = arith.addf %8, %7 : vector<16x128xf32>
    %cst_5 = arith.constant 1.000000e+00 : f32
    %10 = vector.broadcast %cst_5 : f32 to vector<16x128xf32>
    %11 = arith.divf %10, %9 : vector<16x128xf32>
    %c1_i32 = arith.constant 1 : i32
    %12 = arith.muli %arg0, %c1_i32 : i32
    %13 = arith.addi %12, %arg1 : i32
    %14 = tpu.iota {dimensions = array<i32: 0>} : vector<16x128xi32>
    %15 = tpu.iota {dimensions = array<i32: 1>} : vector<16x128xi32>
    %c16_i32 = arith.constant 16 : i32
    %16 = arith.muli %13, %c16_i32 : i32
    %17 = vector.broadcast %16 : i32 to vector<16x128xi32>
    %18 = arith.addi %17, %14 : vector<16x128xi32>
    %c128_i32 = arith.constant 128 : i32
    %19 = vector.broadcast %c128_i32 : i32 to vector<16x128xi32>
    %20 = arith.muli %18, %19 : vector<16x128xi32>
    %21 = arith.addi %20, %15 : vector<16x128xi32>
    %c2048_i32 = arith.constant 2048 : i32
    %22 = vector.broadcast %c2048_i32 : i32 to vector<16x128xi32>
    %23 = arith.cmpi slt, %21, %22 : vector<16x128xi32>
    %cst_6 = arith.constant 0.000000e+00 : f32
    %24 = vector.broadcast %cst_6 : f32 to vector<16x128xf32>
    %25 = arith.select %23, %11, %24 : vector<16x128xi1>, vector<16x128xf32>
    %cst_7 = arith.constant 0.000000e+00 : f32
    %26 = vector.broadcast %cst_7 : f32 to vector<16x128xf32>
    %27 = arith.select %23, %4, %26 : vector<16x128xi1>, vector<16x128xf32>
    %c0_8 = arith.constant 0 : index
    %c0_9 = arith.constant 0 : index
    %c0_10 = arith.constant 0 : index
    %c0_11 = arith.constant 0 : index
    %28 = vector.load %arg4[%c0_8, %c0_9, %c0_10, %c0_11] : memref<1x3x8x128xf32, #tpu.memory_space<vmem>>, vector<1x1x8x128xf32>
    %29 = vector.shape_cast %28 : vector<1x1x8x128xf32> to vector<8x128xf32>
    %30 = arith.mulf %25, %27 : vector<16x128xf32>
    %31 = vector.shape_cast %30 : vector<16x128xf32> to vector<2x8x128xf32>
    %cst_12 = arith.constant dense<0.000000e+00> : vector<8x128xf32>
    %32 = vector.multi_reduction <add>, %31, %cst_12 [0] : vector<2x8x128xf32> to vector<8x128xf32>
    %33 = arith.addf %29, %32 : vector<8x128xf32>
    %c0_13 = arith.constant 0 : index
    %c0_14 = arith.constant 0 : index
    %c0_15 = arith.constant 0 : index
    %c0_16 = arith.constant 0 : index
    %34 = vector.load %arg4[%c0_13, %c0_14, %c0_15, %c0_16] : memref<1x3x8x128xf32, #tpu.memory_space<vmem>>, vector<1x1x8x128xf32>
    %35 = vector.shape_cast %34 : vector<1x1x8x128xf32> to vector<8x128xf32>
    %36 = vector.shape_cast %33 : vector<8x128xf32> to vector<1x1x8x128xf32>
    tpu.vector_store %arg4[%c0_13, %c0_14, %c0_15, %c0_16], %36 {strides = array<i32>} : memref<1x3x8x128xf32, #tpu.memory_space<vmem>>, vector<1x1x8x128xf32>,
    %c0_17 = arith.constant 0 : index
    %c1 = arith.constant 1 : index
    %c0_18 = arith.constant 0 : index
    %c0_19 = arith.constant 0 : index
    %37 = vector.load %arg4[%c0_17, %c1, %c0_18, %c0_19] : memref<1x3x8x128xf32, #tpu.memory_space<vmem>>, vector<1x1x8x128xf32>
    %38 = vector.shape_cast %37 : vector<1x1x8x128xf32> to vector<8x128xf32>
    %39 = vector.shape_cast %25 : vector<16x128xf32> to vector<2x8x128xf32>
    %cst_20 = arith.constant dense<0.000000e+00> : vector<8x128xf32>
    %40 = vector.multi_reduction <add>, %39, %cst_20 [0] : vector<2x8x128xf32> to vector<8x128xf32>
    %41 = arith.addf %38, %40 : vector<8x128xf32>
    %c0_21 = arith.constant 0 : index
    %c1_22 = arith.constant 1 : index
    %c0_23 = arith.constant 0 : index
    %c0_24 = arith.constant 0 : index
    %42 = vector.load %arg4[%c0_21, %c1_22, %c0_23, %c0_24] : memref<1x3x8x128xf32, #tpu.memory_space<vmem>>, vector<1x1x8x128xf32>
    %43 = vector.shape_cast %42 : vector<1x1x8x128xf32> to vector<8x128xf32>
    %44 = vector.shape_cast %41 : vector<8x128xf32> to vector<1x1x8x128xf32>
    tpu.vector_store %arg4[%c0_21, %c1_22, %c0_23, %c0_24], %44 {strides = array<i32>} : memref<1x3x8x128xf32, #tpu.memory_space<vmem>>, vector<1x1x8x128xf32>,
    %c0_25 = arith.constant 0 : index
    %c2 = arith.constant 2 : index
    %c0_26 = arith.constant 0 : index
    %c0_27 = arith.constant 0 : index
    %45 = vector.load %arg4[%c0_25, %c2, %c0_26, %c0_27] : memref<1x3x8x128xf32, #tpu.memory_space<vmem>>, vector<1x1x8x128xf32>
    %46 = vector.shape_cast %45 : vector<1x1x8x128xf32> to vector<8x128xf32>
    %47 = vector.shape_cast %27 : vector<16x128xf32> to vector<2x8x128xf32>
    %cst_28 = arith.constant dense<0.000000e+00> : vector<8x128xf32>
    %48 = vector.multi_reduction <add>, %47, %cst_28 [0] : vector<2x8x128xf32> to vector<8x128xf32>
    %49 = arith.addf %46, %48 : vector<8x128xf32>
    %c0_29 = arith.constant 0 : index
    %c2_30 = arith.constant 2 : index
    %c0_31 = arith.constant 0 : index
    %c0_32 = arith.constant 0 : index
    %50 = vector.load %arg4[%c0_29, %c2_30, %c0_31, %c0_32] : memref<1x3x8x128xf32, #tpu.memory_space<vmem>>, vector<1x1x8x128xf32>
    %51 = vector.shape_cast %50 : vector<1x1x8x128xf32> to vector<8x128xf32>
    %52 = vector.shape_cast %49 : vector<8x128xf32> to vector<1x1x8x128xf32>
    tpu.vector_store %arg4[%c0_29, %c2_30, %c0_31, %c0_32], %52 {strides = array<i32>} : memref<1x3x8x128xf32, #tpu.memory_space<vmem>>, vector<1x1x8x128xf32>,
    return
  }
  func.func @transform_0(%arg0: i32, %arg1: i32) -> (i32, i32) {
    %c1_i32 = arith.constant 1 : i32
    %0 = arith.muli %arg0, %c1_i32 : i32
    %1 = arith.addi %0, %arg1 : i32
    %c0_i32 = arith.constant 0 : i32
    %2 = arith.minsi %1, %c0_i32 : i32
    %c0_i32_0 = arith.constant 0 : i32
    %c0_i32_1 = arith.constant 0 : i32
    return %2, %c0_i32_0 : i32, i32
  }
  func.func @transform_1(%arg0: i32, %arg1: i32) -> (i32, i32) {
    %c1_i32 = arith.constant 1 : i32
    %0 = arith.muli %arg0, %c1_i32 : i32
    %1 = arith.addi %0, %arg1 : i32
    %c0_i32 = arith.constant 0 : i32
    %2 = arith.minsi %1, %c0_i32 : i32
    %c0_i32_0 = arith.constant 0 : i32
    %c0_i32_1 = arith.constant 0 : i32
    return %2, %c0_i32_0 : i32, i32
  }
  func.func @transform_2(%arg0: i32, %arg1: i32) -> (i32, i32, i32, i32) {
    %c0_i32 = arith.constant 0 : i32
    %c0_i32_0 = arith.constant 0 : i32
    %c0_i32_1 = arith.constant 0 : i32
    %c0_i32_2 = arith.constant 0 : i32
    return %arg0, %c0_i32, %c0_i32_0, %c0_i32_1 : i32, i32, i32, i32
  }
}

</mosaic_0001>

<bundles_post_ra>
// kernel: tpu_custom_call.1
= control target key start
LH: loop header
LB: loop body
LE: loop exit
PB: predicated region body
PF: predicated region fallthrough
CT: control target
= control target key end

     0   :  { %7 = vsyncpa [#allocation3], 0  ;;  %s951_s0 = inlined_call_operand.hbm [shape: f32[16,128], index: 0, kind: input, shape index: {}]   ;;  %s952_s1 = inlined_call_operand.hbm [shape: f32[16,128], index: 1, kind: input, shape index: {}]   ;;  %s953_s2 = inlined_call_operand.hbm [shape: f32[2,3,8,128], index: 2, kind: output, shape index: {}]  }
   0x1   :  { %9 = vsyncpa [#allocation3 + $0x1], 0 }
   0x2   :  { %10 = vsyncpa [#allocation6], 0 }
   0x3   :  { %12 = vsyncpa [#allocation6 + $0x1], 0 }
   0x4   :  { %13 = vsyncpa [#allocation4], 0 }
   0x5   :  { %15 = vsyncpa [#allocation4 + $0x1], 0  ;;  %s768_s9 = smov 0   ;;  %s770_s10 = smov 0  }
   0x6   :  { %s772_s11 = smov 0   ;;  %s774_s12 = smov 0  }
   0x7   :  { %s776_s13 = smov 0   ;;  %s778_s14 = smov 0  }
   0x8   :  { %s780_s15 = smov 0   ;;  %s782_s16 = smov 0  }
   0x9 LB: > { %s449_s17 = sadd.s32 4294967295, %s745_s16   ;;  %s450_s18 = sadd.s32 4294967294, %s745_s16   ;;  %s745_s16 = sphi %s782_s16, %s21_s16   ;;  %s741_s15 = sphi %s780_s15, %s965_s15   ;;  %s737_s14 = sphi %s778_s14, %s964_s14   ;;  %s733_s13 = sphi %s776_s13, %s941_s13   ;;  %s729_s12 = sphi %s774_s12, %s963_s12   ;;  %s725_s11 = sphi %s772_s11, %s962_s11   ;;  %s721_s10 = sphi %s770_s10, %s961_s10   ;;  %s717_s9 = sphi %s768_s9, %s960_s9  }
   0xa   : > { %s33_s19 = sadd.s32 1, %s741_s15  ;;  %p714_p1 = scmp.ne.s32.totalorder %s733_s13, 0 }
   0xb   : > { %p35_p0 = scmp.ge.s32.totalorder %s33_s19, 2  ;;  %p54_p2 = scmp.eq.s32.totalorder %s745_s16, 0 }
   0xc   : > { %p59_p3 = scmp.ne.s32.totalorder %s733_s13, %s729_s12  ;;  %p60_p5 = scmp.eq.s32.totalorder %s449_s17, 0 }
   0xd   : > { %s967_s19 = smov (%p35_p0, %s33_s19), 0  ;;  %p814_p4 = por %p714_p1, %p54_p2 }
   0xe   : > { %p818_p6 = por %p60_p5, %p59_p3  ;;  %s101_s22 = ssub.s32 %s741_s15, %s967_s19 }
   0xf   : > { %p102_p7 = scmp.eq.s32.totalorder %s101_s22, 0  ;;  %s104_s23 = sadd.s32 1, %s725_s11 }
  0x10   : > { %p114_p8 = scmp.ne.s32.totalorder %s725_s11, %s721_s10  ;;  %p115_p9 = scmp.eq.s32.totalorder %s449_s17, 1 }
  0x11   : > { %s826_s24 = scalar_select %p102_p7, %s725_s11, %s104_s23  }
  0x12   : > { %p120_p10 = scmp.ne.s32.totalorder %s721_s10, %s717_s9  ;;  %p121_p11 = scmp.eq.s32.totalorder %s450_s18, 1 }
  0x13   : > { %p832_p12 = por %p115_p9, %p114_p8  ;;  %p452_p13 = scmp.ge.s32.totalorder %s745_s16, 2 }
  0x14   : > { %p837_p0 = por %p121_p11, %p120_p10  ;;  %p491_p1 = scmp.lt.s32.totalorder %s745_s16, 2 }
  0x15   : > { %s154_s29 = sshll.u32 %s951_s0, 4  ;;  %s747_s30 = smov [#allocation2]   ;;  %s155_s29 = int_to_ptr.hbm [resolvable:$true] %s154_s29 }
  0x16   : > { %s156_s3 = sshll.u32 %s747_s30, 4  ;;  %p847_p2 = pnand %p491_p1, %p814_p4  ;;  %s157_s3 = int_to_ptr.vmem [resolvable:$true] %s156_s3 }
  0x17   : > { %p459_p3 = scmp.ge.s32.totalorder %s745_s16, 1  ;;  %p189_p5 = scmp.lt.s32.totalorder %s745_s16, 3 }
  0x18   : > { %s578_s5 = sshra.s32 %s155_s29, 4  ;;  %p582_p8 = pneg %p847_p2  ;;  %s579_s5 = int_to_ptr.hbm [resolvable:$true] %s578_s5 }
  0x19   : > { %s580_s6 = scalar_lea.hbm %s579_s5, 16  ;;  %s585_s12 = scalar_lea.hbm %s951_s0, 16 }
  0x1a   : > { %p581_p7 = scmp.ne.s32.totalorder %s579_s5, %s580_s6  ;;  %p587_p4 = scmp.lt.s32.totalorder %s585_s12, %s580_s6 }
  0x1c   : > { %p583_p9 = pnand %p582_p8, %p581_p7 }
  0x1e   : > { %p584_p10 = pneg %p583_p9 }
  0x20   : > { %p589_p11 = pnand %p587_p4, %p584_p10 }
  0x22   : > { %592 = shalt.err (!%p589_p11)
}
  0x23   : > { %s748_s17 = smov 128   ;;  %s749_s18 = smov 8  }
  0x24   : > { %483 = dma.hbm_to_vmem [thread:$0]  (!%p847_p2), %s155_s29, 256, %s157_s3, [#allocation3], %s748_s17, %s748_s17, %s749_s18  }
  0x25   : > { %p867_p1 = pnand %p459_p3, %p189_p5  ;;  %s179_s27 = sshll.u32 %s952_s1, 4  ;;  %s180_s27 = int_to_ptr.hbm [resolvable:$true] %s179_s27 }
  0x26   : > { %s750_s28 = smov [#allocation5]   ;;  %s608_s5 = sshra.s32 %s180_s27, 4  ;;  %s609_s5 = int_to_ptr.hbm [resolvable:$true] %s608_s5 }
  0x27   : > { %s181_s30 = sshll.u32 %s750_s28, 4  ;;  %s610_s6 = scalar_lea.hbm %s609_s5, 16  ;;  %s182_s30 = int_to_ptr.vmem [resolvable:$true] %s181_s30 }
  0x28   : > { %p611_p7 = scmp.ne.s32.totalorder %s609_s5, %s610_s6  ;;  %s615_s7 = scalar_lea.hbm %s952_s1, 16 }
  0x29   : > { %p617_p3 = scmp.lt.s32.totalorder %s615_s7, %s610_s6 }
  0x2a   : > { %p613_p9 = pnand %p611_p7, %p582_p8 }
  0x2c   : > { %p614_p10 = pneg %p613_p9 }
  0x2e   : > { %p619_p5 = pnand %p617_p3, %p614_p10 }
  0x30   : > { %622 = shalt.err (!%p619_p5)
}
  0x31   : > { %486 = dma.hbm_to_vmem [thread:$0]  (!%p847_p2), %s180_s27, 256, %s182_s30, [#allocation6], %s748_s17, %s748_s17, %s749_s18  }
  0x32   : > { %193 = sbr.rel (%p867_p1) target bundleno = 99 (0x63), region = 28  ;;  %s195_s8 = sand.u32 (!%p867_p1), 1, %s733_s13  }
  0x33   : > { %s460_s12 = sshll.u32 (!%p867_p1), %s195_s8, 4  ;;  %s196_s22 = scalar_lea.sflag (!%p867_p1), [#allocation3], %s195_s8 }
  0x34   : > { %s199_s23 = scalar_lea.vmem (!%p867_p1), [#allocation2], %s460_s12 }
  0x37   : > { %703 = dma.done.wait (%p818_p6), %s196_s22, 256  }
  0x38   : > { %705 = vsyncadd (%p818_p6), %s196_s22, 4294967040  ;;  %s206_s28 = scalar_lea.sflag [#allocation6], %s195_s8  ;;  %s209_s5 = scalar_lea.vmem [#allocation5], %s460_s12 }
  0x39   : > { %707 = dma.done.wait (%p818_p6), %s206_s28, 256  }
  0x3a   : > { %709 = vsyncadd (%p818_p6), %s206_s28, 4294967040  ;;  %v294_v0 = vlaneseq  ;;  %s462_s4 = sshll.u32 %s737_s14, 4  ;;  %v251_v8 = vld [vmem:[%s199_s23] sm:$0xff]  ;;  %v252_v9 = vld [vmem:[%s199_s23 + $0x8] sm:$0xff]  ;;  %s233_s17 = sand.u32 1, %s721_s10  }
  0x3b   : > { %v300_v1 = vstv %s462_s4  ;;  %v255_v10 = vsub.f32 0.0, %v251_v8  ;;  %v256_v11 = vsub.f32 0.0, %v252_v9  ;;  %v253_v14 = vld [vmem:[%s209_s5] sm:$0xff]  ;;  %v254_v15 = vld [vmem:[%s209_s5 + $0x8] sm:$0xff]  ;;  %s472_s21 = smul.u32 24, %s233_s17  ;;  %s330_s3 = scalar_lea.sflag [#allocation4], %s233_s17 }
  0x3c   : > { %v295_v2 = vshrl.u32 %v294_v0, 7  ;;  %v298_v4 = vand.u32 127, %v294_v0  ;;  %s473_s20 = smul.u32 24, %s737_s14  ;;  %s658_s23 = scalar_lea.hbm %s953_s2, 48 }
  0x3d   : > { %v257_v16 = vmul.f32 1.442695, %v255_v10  ;;  %v259_v17 = vmul.f32 1.442695, %v256_v11  ;;  %s899_s18 = scalar_lea.vmem [#allocation7], %s472_s21 }
  0x3e   : > { %v296_v3 = vadd.s32 8, %v295_v2  ;;  %v301_v5 = vadd.s32 %v300_v1, %v295_v2  ;;  %s341_s6 = scalar_lea.hbm %s953_s2, %s473_s20  ;;  %s342_s14 = sshll.u32 %s899_s18, 4  ;;  %s343_s14 = int_to_ptr.vmem [resolvable:$true] %s342_s14 }
  0x3f   : > { %570 = vpow2.f32 %v257_v16  ;;  %s344_s29 = sshll.u32 %s341_s6, 4  ;;  %s345_s29 = int_to_ptr.hbm [resolvable:$true] %s344_s29 }
  0x40   : > { %v302_v6 = vadd.s32 %v300_v1, %v296_v3  ;;  %v303_v7 = vmul.u32 128, %v301_v5  ;;  %572 = vpow2.f32 %v259_v17  ;;  %s652_s7 = sshra.s32 %s345_s29, 4  ;;  %s653_s7 = int_to_ptr.hbm [resolvable:$true] %s652_s7 }
  0x41   : > { %s654_s8 = scalar_lea.hbm %s653_s7, 24  ;;  %p659_p4 = scmp.lt.s32.totalorder %s653_s7, %s953_s2 }
  0x42   : > { %v304_v12 = vmul.u32 128, %v302_v6  ;;  %v305_v13 = vadd.s32 %v303_v7, %v298_v4  ;;  %p655_p6 = scmp.ne.s32.totalorder %s653_s7, %s654_s8  ;;  %p660_p11 = scmp.lt.s32.totalorder %s658_s23, %s654_s8 }
  0x44   : > { %v306_v18 = vadd.s32 %v304_v12, %v298_v4  ;;  %vm307_vm0 = vcmp.lt.s32.totalorder %v305_v13, 2048  ;;  %p656_p2 = pnand %p655_p6, %p832_p12  ;;  %p661_p1 = por %p660_p11, %p659_p4 }
  0x45   : > { %v311_v19 = vsel %vm307_vm0, %v253_v14, 0.0  ;;  %v571_v22 = vpop.eup %570 }
  0x46   : > { %vm308_vm1 = vcmp.lt.s32.totalorder %v306_v18, 2048  ;;  %v573_v23 = vpop.eup %572  ;;  %v261_v24 = vadd.f32 1.0, %v571_v22  ;;  %p657_p8 = pneg %p656_p2 }
  0x47   : > { %v312_v20 = vsel %vm308_vm1, %v254_v15, 0.0  ;;  %v262_v25 = vadd.f32 1.0, %v573_v23 }
  0x48   : > { %v326_v21 = vadd.f32 %v312_v20, %v311_v19  ;;  %574 = vrcp.f32 %v261_v24  ;;  %vm268_vm2 = vweird.f32 %v261_v24  ;;  %v274_v29 = vand.u32 2147483648, %v261_v24  ;;  %p662_p7 = pnand %p661_p1, %p657_p8 }
  0x49   : > { %576 = vrcp.f32 %v262_v25  ;;  %v272_v32 = vand.u32 2147483647, %v261_v24  ;;  %v289_v33 = vand.u32 2147483648, %v262_v25  ;;  %vm283_vm4 = vweird.f32 %v262_v25 }
  0x4a   : > { %466 = vst [vmem:[%s899_s18 + $0x10] sm:$0xff] %v326_v21  ;;  %v287_v35 = vand.u32 2147483647, %v262_v25  ;;  %v275_v37 = vor.u32 1.1754944e-38, %v274_v29 }
  0x4b   : > { %vm273_vm7 = vcmp.eq.f32.partialorder %v272_v32, 8.507059e+37  ;;  %v290_v40 = vor.u32 1.1754944e-38, %v289_v33 }
  0x4c   : > { %vm288_vm9 = vcmp.eq.f32.partialorder %v287_v35, 8.507059e+37 }
  0x4e   : > { %v575_v26 = vpop.eup %574 }
  0x4f   : > { %v577_v27 = vpop.eup %576  ;;  %v264_v28 = vmul.f32 %v575_v26, %v261_v24  ;;  %vm269_vm3 = vweird.f32 %v575_v26 }
  0x50   : > { %v279_v30 = vmul.f32 %v577_v27, %v262_v25  ;;  %vm284_vm5 = vweird.f32 %v577_v27  ;;  %vm270_vm6 = vmor %vm268_vm2, %vm269_vm3 }
  0x51   : > { %v265_v31 = vsub.f32 1.0, %v264_v28  ;;  %vm285_vm8 = vmor %vm283_vm4, %vm284_vm5 }
  0x52   : > { %v280_v34 = vsub.f32 1.0, %v279_v30 }
  0x53   : > { %v266_v36 = vmul.f32 %v575_v26, %v265_v31 }
  0x54   : > { %v281_v38 = vmul.f32 %v577_v27, %v280_v34 }
  0x55   : > { %v267_v39 = vadd.f32 %v575_v26, %v266_v36 }
  0x56   : > { %v282_v41 = vadd.f32 %v577_v27, %v281_v38 }
  0x57   : > { %v271_v42 = vsel %vm270_vm6, %v575_v26, %v267_v39 }
  0x58   : > { %v276_v43 = vsel %vm273_vm7, %v275_v37, %v271_v42  ;;  %v286_v44 = vsel %vm285_vm8, %v577_v27, %v282_v41 }
  0x59   : > { %v291_v45 = vsel %vm288_vm9, %v290_v40, %v286_v44  ;;  %v309_v46 = vsel %vm307_vm0, %v276_v43, 0.0 }
  0x5a   : > { %v310_v47 = vsel %vm308_vm1, %v291_v45, 0.0  ;;  %v314_v48 = vmul.f32 %v311_v19, %v309_v46 }
  0x5b   : > { %v315_v49 = vmul.f32 %v312_v20, %v310_v47  ;;  %v321_v50 = vadd.f32 %v310_v47, %v309_v46 }
  0x5d   : > { %v316_v51 = vadd.f32 %v315_v49, %v314_v48  ;;  %464 = vst [vmem:[%s899_s18 + $0x8] sm:$0xff] %v321_v50 }
  0x5f   : > { %318 = vst [vmem:[%s899_s18] sm:$0xff] %v316_v51 }
  0x60   : > { %665 = shalt.err (!%p662_p7)
}
  0x61   : > { %s751_s4 = smov 128   ;;  %s752_s17 = smov 8  }
  0x62   : > { %478 = dma.vmem_to_hbm [thread:$0]  (%p832_p12), %s343_s14, 384, %s345_s29, %s330_s3, %s751_s4, %s751_s4, %s752_s17  }
  0x63 PF: > { %s359_s21 = sand.u32 1, %s717_s9   ;;  %p488_p9 = pnand %p452_p13, %p837_p0 }
  0x64   : > { %s360_s18 = scalar_lea.sflag [#allocation4], %s359_s21 }
  0x65   : > { %p489_p10 = pneg %p488_p9 }
  0x67   : > { %711 = dma.done.wait (%p489_p10), %s360_s18, 384  }
  0x68   : > { %713 = vsyncadd (%p489_p10), %s360_s18, 4294966912  ;;  %s21_s16 = sadd.s32 1, %s745_s16   ;;  %s960_s9 = smov %s721_s10 }
  0x69   : > { %p18_p3 = scmp.ge.s32.totalorder %s21_s16, 4   ;;  %s961_s10 = smov %s725_s11 }
  0x6a   : > { %s962_s11 = smov %s826_s24  ;;  %s963_s12 = smov %s733_s13 }
  0x6b   : > { %s941_s13 = smov 0   ;;  %s964_s14 = smov %s741_s15 }
  0x6c   : > { %s965_s15 = smov %s967_s19  ;;  %20 = sbr.rel (!%p18_p3) target bundleno = 9 (0x9), region = 92 }
  0x71   :  { %366 = vsyncpa [#allocation3], 1 }
  0x72   :  { %368 = vsyncpa [#allocation3 + $0x1], 1 }
  0x73   :  { %369 = vsyncpa [#allocation6], 1 }
  0x74   :  { %371 = vsyncpa [#allocation6 + $0x1], 1 }
  0x75   :  { %372 = vsyncpa [#allocation4], 1 }
  0x76   :  { %374 = vsyncpa [#allocation4 + $0x1], 1 }

</bundles_post_ra>
